<compile_context>
chip_gen: v7x
topology: tpu7x:2x2x1
jax: 0.10.0
libtpu: 0.0.40
codegen_flags: <defaults>
</compile_context>

<pallas_src>
import functools

import jax
import jax.numpy as jnp
from jax import lax
from jax.experimental import pallas as pl
from jax.experimental.pallas import tpu as pltpu


def _sigmoid(z):
    # sigmoid(z) == 0.5*tanh(0.5*z) + 0.5 : one EUP op (tanh) + VPU fma,
    # instead of jax.nn.sigmoid's exp + divide (two EUP-class ops).
    return 0.5 * jnp.tanh(0.5 * z) + 0.5


def two_layer_mlp_kernel(x_t_ref, w1_ref, b1_ref, w2_ref, b2_ref, o_t_ref, *,
                         small_out):
    x_t = x_t_ref[...]                               # (In, TB), batch on lanes

    # Layer 1: h^T = sigmoid(W1 @ x^T + b1).  W1 keeps its PyTorch (H, In)
    # layout; (1,0) contraction => no in-kernel transpose of either operand.
    h_t = lax.dot_general(
        w1_ref[...], x_t,
        dimension_numbers=(((1,), (0,)), ((), ())),
        preferred_element_type=jnp.float32,
    )
    h_t = _sigmoid(h_t + b1_ref[...])                # (H, TB)

    if small_out:
        # Tiny output dim: w2_ref is pre-transposed (H, Out).  Second layer on
        # the VPU/XLU (broadcast multiply + sublane reduce per column) instead
        # of a mostly-padding MXU matmul.
        w2_t = w2_ref[...]                           # (H, Out)
        cols = [
            jnp.sum(h_t * w2_t[:, o:o + 1], axis=0, keepdims=True)  # (1, TB)
            for o in range(w2_t.shape[1])
        ]
        y_t = cols[0] if len(cols) == 1 else jnp.concatenate(cols, axis=0)
    else:
        # w2_ref is PyTorch (Out, H); again a plain (1,0) contraction on MXU.
        y_t = lax.dot_general(
            w2_ref[...], h_t,
            dimension_numbers=(((1,), (0,)), ((), ())),
            preferred_element_type=jnp.float32,
        )

    o_t_ref[...] = _sigmoid(y_t + b2_ref[...]).astype(o_t_ref.dtype)  # (Out, TB)


def _pick_block_n(batch: int, cap: int = 1024) -> int:
    """Batch lives on the lane axis: use the full batch (<=128) or a multiple
    of 128 chosen so grid steps are as few and as balanced as possible."""
    if batch <= 128:
        return batch                     # equals full dim -> satisfies (8,128)
    cap = max(128, min(cap, batch))
    n_tiles = pl.cdiv(batch, cap)
    blk = pl.cdiv(batch, n_tiles)
    blk = ((blk + 127) // 128) * 128     # lane-axis multiple of 128
    return min(blk, cap)


def _vmem_estimate(input_size, hidden, out_size, block_n):
    f32 = 4
    resident = (hidden * input_size + hidden + out_size * hidden + out_size) * f32
    streamed = 2 * (input_size + out_size) * block_n * f32   # double-buffered tiles
    live = 4 * hidden * block_n * f32                        # f32 intermediates
    return 2 * resident + streamed + live


def two_layer_net(x, w1, b1, w2, b2, *, block_n=None):
    """Forward pass of TwoLayerNet_pytorch.

    x:  (batch, input_size)
    w1: (hidden_size, input_size)   -- PyTorch nn.Linear weight layout
    b1: (hidden_size,)
    w2: (output_size, hidden_size)
    b2: (output_size,)
    returns (batch, output_size)
    """
    batch, input_size = x.shape
    hidden_size = w1.shape[0]
    output_size = w2.shape[0]

    if block_n is None:
        block_n = _pick_block_n(batch)
    block_n = min(block_n, batch)

    small_out = output_size <= 8

    # One-time wrapper-side layout plumbing (outside the kernel):
    x_t = x.T                                            # (In, batch)
    w2_k = w2.T if small_out else w2                     # (H, Out) or (Out, H)
    b1_col = b1.reshape(hidden_size, 1)                  # broadcast over lanes
    b2_col = b2.reshape(output_size, 1)

    grid = (pl.cdiv(batch, block_n),)

    cp_kwargs = dict(dimension_semantics=("parallel",))
    est = _vmem_estimate(input_size, hidden_size, output_size, block_n)
    if est > (16 << 20):                                  # v5e scoped default
        cp_kwargs["vmem_limit_bytes"] = min(int(2 * est), 64 << 20)

    kernel = functools.partial(two_layer_mlp_kernel, small_out=small_out)

    y_t = pl.pallas_call(
        kernel,
        out_shape=jax.ShapeDtypeStruct((output_size, batch), x.dtype),
        grid_spec=pltpu.PrefetchScalarGridSpec(
            num_scalar_prefetch=0,
            grid=grid,
            in_specs=[
                # Activations stream over the batch (lane) axis.
                pl.BlockSpec((input_size, block_n), lambda i: (0, i)),
                # Weights / biases: VMEM-resident across all grid steps.
                pl.BlockSpec((hidden_size, input_size), lambda i: (0, 0)),
                pl.BlockSpec((hidden_size, 1), lambda i: (0, 0)),
                pl.BlockSpec(w2_k.shape, lambda i: (0, 0)),
                pl.BlockSpec((output_size, 1), lambda i: (0, 0)),
            ],
            out_specs=pl.BlockSpec((output_size, block_n), lambda i: (0, i)),
        ),
        compiler_params=pltpu.CompilerParams(**cp_kwargs),
    )(x_t, w1, b1_col, w2_k, b2_col)

    return y_t.T                                         # (batch, output_size)


if __name__ == "__main__":
    # XOR-style problem sizes (input=2, hidden=8, output=1).  batch=256 with an
    # explicit block_n=128 exercises the grid/streaming path (2 tiles); the
    # default picker would choose grid=1 (block_n=256) here.
    batch, input_size, hidden_size, output_size = 256, 2, 8, 1

    key = jax.random.PRNGKey(0)
    k_x, k_w1, k_b1, k_w2, k_b2 = jax.random.split(key, 5)

    x = jax.random.normal(k_x, (batch, input_size), dtype=jnp.float32)
    bound1 = 1.0 / (input_size ** 0.5)
    w1 = jax.random.uniform(k_w1, (hidden_size, input_size), jnp.float32, -bound1, bound1)
    b1 = jax.random.uniform(k_b1, (hidden_size,), jnp.float32, -bound1, bound1)
    bound2 = 1.0 / (hidden_size ** 0.5)
    w2 = jax.random.uniform(k_w2, (output_size, hidden_size), jnp.float32, -bound2, bound2)
    b2 = jax.random.uniform(k_b2, (output_size,), jnp.float32, -bound2, bound2)

    y = two_layer_net(x, w1, b1, w2, b2, block_n=128)
    y = jax.block_until_ready(y)

    # Pure-JAX reference.
    h_ref = jax.nn.sigmoid(x @ w1.T + b1)
    y_ref = jax.nn.sigmoid(h_ref @ w2.T + b2)
    assert y.shape == (batch, output_size)
    assert jnp.allclose(y, y_ref, atol=1e-5), "mismatch vs reference"

    print("KERNEL_OK")
</pallas_src>

<mosaic_0001>
module attributes {stable_mosaic.version = 11 : i64} {
  func.func @two_layer_mlp_kernel(%arg0: i32, %arg1: memref<2x128xf32, #tpu.memory_space<vmem>>, %arg2: memref<8x2xf32, #tpu.memory_space<vmem>>, %arg3: memref<8x1xf32, #tpu.memory_space<vmem>>, %arg4: memref<8x1xf32, #tpu.memory_space<vmem>>, %arg5: memref<1x1xf32, #tpu.memory_space<vmem>>, %arg6: memref<1x128xf32, #tpu.memory_space<vmem>>) attributes {dimension_semantics = [#tpu.dimension_semantics<parallel>], iteration_bounds = array<i64: 2>, scalar_prefetch = 0 : i64, scratch_operands = 0 : i64, tpu.core_type = #tpu.core_type<tc>, window_params = [{transform_indices = @transform_0, window_bounds = array<i64: 2, 128>}, {pipeline_mode = #tpu.pipeline_mode<synchronous>, transform_indices = @transform_1, window_bounds = array<i64: 8, 2>}, {pipeline_mode = #tpu.pipeline_mode<synchronous>, transform_indices = @transform_2, window_bounds = array<i64: 8, 1>}, {pipeline_mode = #tpu.pipeline_mode<synchronous>, transform_indices = @transform_3, window_bounds = array<i64: 8, 1>}, {pipeline_mode = #tpu.pipeline_mode<synchronous>, transform_indices = @transform_4, window_bounds = array<i64: 1, 1>}, {transform_indices = @transform_5, window_bounds = array<i64: 1, 128>}]} {
    %c0 = arith.constant 0 : index
    %c0_0 = arith.constant 0 : index
    %0 = vector.load %arg1[%c0, %c0_0] : memref<2x128xf32, #tpu.memory_space<vmem>>, vector<2x128xf32>
    %c0_1 = arith.constant 0 : index
    %c0_2 = arith.constant 0 : index
    %1 = vector.load %arg2[%c0_1, %c0_2] : memref<8x2xf32, #tpu.memory_space<vmem>>, vector<8x2xf32>
    %cst = arith.constant dense<0.000000e+00> : vector<8x128xf32>
    %2 = tpu.matmul %1, %0, %cst {dimension_numbers = #tpu.dot_dimension_numbers<[1], [0], [0], [1], [0, 0, 1, 1], [], []>} : vector<8x2xf32>, vector<2x128xf32>, vector<8x128xf32> -> vector<8x128xf32>
    %c0_3 = arith.constant 0 : index
    %c0_4 = arith.constant 0 : index
    %3 = vector.load %arg3[%c0_3, %c0_4] : memref<8x1xf32, #tpu.memory_space<vmem>>, vector<8x1xf32>
    %4 = vector.broadcast %3 : vector<8x1xf32> to vector<8x128xf32>
    %5 = arith.addf %2, %4 : vector<8x128xf32>
    %cst_5 = arith.constant 5.000000e-01 : f32
    %6 = vector.broadcast %cst_5 : f32 to vector<8x128xf32>
    %7 = arith.mulf %6, %5 : vector<8x128xf32>
    %8 = math.tanh %7 : vector<8x128xf32>
    %cst_6 = arith.constant 5.000000e-01 : f32
    %9 = vector.broadcast %cst_6 : f32 to vector<8x128xf32>
    %10 = arith.mulf %9, %8 : vector<8x128xf32>
    %cst_7 = arith.constant 5.000000e-01 : f32
    %11 = vector.broadcast %cst_7 : f32 to vector<8x128xf32>
    %12 = arith.addf %10, %11 : vector<8x128xf32>
    %c0_8 = arith.constant 0 : index
    %c0_9 = arith.constant 0 : index
    %13 = vector.load %arg4[%c0_8, %c0_9] : memref<8x1xf32, #tpu.memory_space<vmem>>, vector<8x1xf32>
    %14 = vector.broadcast %13 : vector<8x1xf32> to vector<8x128xf32>
    %15 = arith.mulf %12, %14 : vector<8x128xf32>
    %cst_10 = arith.constant dense<0.000000e+00> : vector<128xf32>
    %16 = vector.multi_reduction <add>, %15, %cst_10 [0] : vector<8x128xf32> to vector<128xf32>
    %17 = vector.shape_cast %16 : vector<128xf32> to vector<1x128xf32>
    %c0_11 = arith.constant 0 : index
    %c0_12 = arith.constant 0 : index
    %18 = vector.load %arg5[%c0_11, %c0_12] : memref<1x1xf32, #tpu.memory_space<vmem>>, vector<1x1xf32>
    %19 = vector.broadcast %18 : vector<1x1xf32> to vector<1x128xf32>
    %20 = arith.addf %17, %19 : vector<1x128xf32>
    %cst_13 = arith.constant 5.000000e-01 : f32
    %21 = vector.broadcast %cst_13 : f32 to vector<1x128xf32>
    %22 = arith.mulf %21, %20 : vector<1x128xf32>
    %23 = math.tanh %22 : vector<1x128xf32>
    %cst_14 = arith.constant 5.000000e-01 : f32
    %24 = vector.broadcast %cst_14 : f32 to vector<1x128xf32>
    %25 = arith.mulf %24, %23 : vector<1x128xf32>
    %cst_15 = arith.constant 5.000000e-01 : f32
    %26 = vector.broadcast %cst_15 : f32 to vector<1x128xf32>
    %27 = arith.addf %25, %26 : vector<1x128xf32>
    %c0_16 = arith.constant 0 : index
    %c0_17 = arith.constant 0 : index
    %28 = vector.load %arg6[%c0_16, %c0_17] : memref<1x128xf32, #tpu.memory_space<vmem>>, vector<1x128xf32>
    tpu.vector_store %arg6[%c0_16, %c0_17], %27 {strides = array<i32>} : memref<1x128xf32, #tpu.memory_space<vmem>>, vector<1x128xf32>,
    return
  }
  func.func @transform_0(%arg0: i32) -> (i32, i32) {
    %c0_i32 = arith.constant 0 : i32
    %c0_i32_0 = arith.constant 0 : i32
    return %c0_i32, %arg0 : i32, i32
  }
  func.func @transform_1(%arg0: i32) -> (i32, i32) {
    %c0_i32 = arith.constant 0 : i32
    %c0_i32_0 = arith.constant 0 : i32
    %c0_i32_1 = arith.constant 0 : i32
    return %c0_i32, %c0_i32_0 : i32, i32
  }
  func.func @transform_2(%arg0: i32) -> (i32, i32) {
    %c0_i32 = arith.constant 0 : i32
    %c0_i32_0 = arith.constant 0 : i32
    %c0_i32_1 = arith.constant 0 : i32
    return %c0_i32, %c0_i32_0 : i32, i32
  }
  func.func @transform_3(%arg0: i32) -> (i32, i32) {
    %c0_i32 = arith.constant 0 : i32
    %c0_i32_0 = arith.constant 0 : i32
    %c0_i32_1 = arith.constant 0 : i32
    return %c0_i32, %c0_i32_0 : i32, i32
  }
  func.func @transform_4(%arg0: i32) -> (i32, i32) {
    %c0_i32 = arith.constant 0 : i32
    %c0_i32_0 = arith.constant 0 : i32
    %c0_i32_1 = arith.constant 0 : i32
    return %c0_i32, %c0_i32_0 : i32, i32
  }
  func.func @transform_5(%arg0: i32) -> (i32, i32) {
    %c0_i32 = arith.constant 0 : i32
    %c0_i32_0 = arith.constant 0 : i32
    return %c0_i32, %arg0 : i32, i32
  }
}

</mosaic_0001>

<bundles_post_ra>
// kernel: tpu_custom_call.1
= control target key start
LH: loop header
LB: loop body
LE: loop exit
PB: predicated region body
PF: predicated region fallthrough
CT: control target
= control target key end

     0   :  { %s683_s0 = inlined_call_operand.vmem [shape: f32[2,256], index: 0, kind: input, shape index: {}]   ;;  %s684_s1 = inlined_call_operand.vmem [shape: f32[8,2], index: 1, kind: input, shape index: {}]   ;;  %s685_s2 = inlined_call_operand.vmem [shape: f32[8,1], index: 2, kind: input, shape index: {}]   ;;  %s686_s3 = inlined_call_operand.vmem [shape: f32[8,1], index: 3, kind: input, shape index: {}]   ;;  %s687_s4 = inlined_call_operand.<no memory space> [shape: f32[1,1], index: 4, kind: input, shape index: {}]   ;;  %s688_s5 = inlined_call_operand.hbm [shape: f32[1,256], index: 5, kind: output, shape index: {}]  }
   0x1   :  { %v10_v0 = vstv %s687_s4 }
   0x2   :  { %11 = vst [vmem:[#allocation2] sm:$0x1] %v10_v0 }
   0x3   :  { %12 = vsyncpa [#allocation4], 0 }
   0x4   :  { %14 = vsyncpa [#allocation4 + $0x1], 0  ;;  %s574_s20 = smov 0   ;;  %s576_s21 = smov 0  }
   0x5   :  { %s578_s22 = smov 0   ;;  %s580_s23 = smov 0  }
   0x6 LB: > { %s595_s4 = sadd.s32 4294967295, %s535_s23   ;;  %s408_s24 = sadd.s32 4294967294, %s535_s23   ;;  %s535_s23 = sphi %s580_s23, %s694_s23   ;;  %s531_s22 = sphi %s578_s22, %s693_s22   ;;  %s527_s21 = sphi %s576_s21, %s692_s21   ;;  %s523_s20 = sphi %s574_s20, %s691_s20  }
   0x7   : > { %s599_s25 = sadd.s32 1, %s535_s23   ;;  %s137_s26 = sadd.s32 1, %s531_s22 }
   0x8   : > { %s134_s27 = ssub.s32 %s535_s23, %s599_s25  ;;  %p147_p0 = scmp.ne.s32.totalorder %s531_s22, %s527_s21 }
   0x9   : > { %p135_p1 = scmp.eq.s32.totalorder %s134_s27, 0  ;;  %p148_p2 = scmp.eq.s32.totalorder %s595_s4, 1 }
   0xa   : > { %p153_p3 = scmp.ne.s32.totalorder %s527_s21, %s523_s20  ;;  %p154_p4 = scmp.eq.s32.totalorder %s408_s24, 1 }
   0xb   : > { %s610_s28 = scalar_select %p135_p1, %s531_s22, %s137_s26  }
   0xc   : > { %p612_p5 = por %p148_p2, %p147_p0  ;;  %p616_p6 = por %p154_p4, %p153_p3 }
   0xd   : > { %p411_p7 = scmp.ge.s32.totalorder %s535_s23, 1  ;;  %p191_p8 = scmp.lt.s32.totalorder %s535_s23, 3 }
   0xf   : > { %p192_p9 = pnand %p411_p7, %p191_p8 }
  0x10   : > { %p217_p10 = scmp.lt.s32.totalorder (!%p192_p9), %s595_s4, 1  ;;  %v537_v1 = vmov (!%p192_p9), 0.0   ;;  %vm538_vm0 = vmmov (!%p192_p9), 0   ;;  %v223_v2 = vld [vmem:[%s685_s2] sm:$0xff] (!%p192_p9)  ;;  %v539_v4 = vmov (!%p192_p9), 0   ;;  %vm233_vm1 = vcmask (!%p192_p9), 1041408  }
  0x11   : > { %195 = sbr.rel (%p192_p9) target bundleno = 308 (0x134), region = 40  ;;  %420 = vmatprep.subr.mxu0 (!%p192_p9), %v537_v1  ;;  %422 = vmatprep.mubr.msk.f32.mxu0 (!%p192_p9), %vm538_vm0, %v537_v1  ;;  %v324_v3 = vld [vmem:[#allocation2] sm:$0x1] (!%p192_p9)  ;;  %vm229_vm2 = vcmask (!%p192_p9), 15360   ;;  %v330_v16 = vlaneseq (!%p192_p9)  ;;  %s215_s17 = sand.u32 (!%p192_p9), 1, %s527_s21  }
  0x12   : > { %467 = vset.pattern.permute.xlu0 (!%p192_p9), %v539_v4  ;;  %468 = vset.pattern.permute.xlu1 (!%p192_p9), %v539_v4  ;;  %v311_v5 = vld [vmem:[%s686_s3] sm:$0xff] (!%p192_p9)  ;;  %s415_s18 = sshll.u32 (!%p192_p9), %s595_s4, 4  ;;  %s216_s19 = scalar_lea.vmem (!%p192_p9), [#allocation3], %s215_s17 }
  0x13   : > { %226 = vperm.xlu0 (!%p192_p9), %467, %v223_v2   ;;  %327 = vperm.xlu1 (!%p192_p9), %468, %v324_v3   ;;  %v222_v6 = vld [vmem:[%s684_s1] sm:$0xff] (!%p192_p9)  ;;  %v331_v20 = vshrl.u32 (!%p192_p9), %v330_v16, 7  ;;  %s353_s24 = sshll.u32 (!%p192_p9), %s216_s19, 4  ;;  %s641_s6 = scalar_lea.hbm (!%p192_p9), %s688_s5, %s415_s18  ;;  %s643_s24 = int_to_ptr.vmem [resolvable:$true] %s353_s24 }
  0x14   : > { %s341_s7 = scalar_lea.sflag (!%p192_p9), [#allocation4], %s215_s17 }
  0x15   : > { %v332_v22 = vsub.s32 (!%p192_p9), 0, %v331_v20 }
  0x17   : > { %314 = vperm.xlu0 (!%p192_p9), %467, %v311_v5  }
  0x18   : > { %s218_s8 = scalar_select %p217_p10, %s595_s4, 1 }
  0x19   : > { %s540_s4 = smov [#allocation3]  }
  0x1a   : > { %s412_s9 = sshll.u32 %s218_s8, 1  ;;  %s473_s8 = scalar_lea.vmem %s643_s24, 16 }
  0x1b   : > { %s220_s14 = scalar_lea.vmem %s683_s0, %s412_s9  ;;  %p474_p11 = scmp.ne.s32.totalorder %s643_s24, %s473_s8 }
  0x1c   : > { %v221_v7 = vld [vmem:[%s220_s14] sm:$0x3]  ;;  %s477_s9 = sshll.u32 %s540_s4, 4  ;;  %s478_s9 = int_to_ptr.vmem [resolvable:$false] %s477_s9 }
  0x1d   : > { %421 = vmatpush3.msk.msra.mxu0 %vm233_vm1, %v221_v7  ;;  %p475_p12 = pnand %p474_p11, %p612_p5  ;;  %s479_s10 = scalar_lea.vmem %s478_s9, 32 }
  0x1e   : > { %423 = vmatmul.mubr.msk.f32.vlgmr.msra.gmra.mrb[0].mxu0 %vm229_vm2, %v222_v6  ;;  %p480_p0 = scmp.lt.s32.totalorder %s643_s24, %s478_s9  ;;  %p481_p1 = scmp.lt.s32.totalorder %s479_s10, %s473_s8 }
  0x1f   : > { %p476_p13 = pneg %p475_p12 }
  0x20   : > { %p482_p2 = por %p481_p1, %p480_p0 }
  0x22   : > { %p483_p3 = pnand %p482_p2, %p476_p13 }
  0x92   : > { %v227_v8 = vpop.permute.xlu0 %226  ;;  %v328_v24 = vpop.permute.xlu1 %327 }
  0x93   : > { %v333_v27 = vrot.slane %v328_v24, %v332_v22 }
  0x96   : > { %v315_v17 = vpop.permute.xlu0 %314 }
  0xf1   : > { %v303_v9 = vpop.f32.mrb[0].mxu0 }
  0xf2   : > { %v304_v10 = vadd.f32 %v303_v9, %v227_v8  ;;  %v424_v11 = vpop.f32.mrb[1].mxu0 }
  0xf4   : > { %v307_v12 = vmul.f32 0.5, %v304_v10 }
  0xf6   : > { %469 = vtanh.f32 %v307_v12 }
 0x100   : > { %v470_v13 = vpop.eup %469 }
 0x101   : > { %v309_v14 = vmul.f32 0.5, %v470_v13 }
 0x103   : > { %v310_v15 = vadd.f32 0.5, %v309_v14 }
 0x105   : > { %v317_v18 = vmul.f32 %v315_v17, %v310_v15 }
 0x107   : > { %v318_v19 = vrot.slane %v317_v18, 4 }
 0x109   : > { %v319_v21 = vadd.f32 %v318_v19, %v317_v18 }
 0x10b   : > { %v320_v23 = vrot.slane %v319_v21, 2 }
 0x10d   : > { %v321_v25 = vadd.f32 %v320_v23, %v319_v21 }
 0x10f   : > { %v322_v26 = vrot.slane %v321_v25, 1 }
 0x111   : > { %v323_v28 = vadd.f32 %v322_v26, %v321_v25 }
 0x113   : > { %v334_v29 = vadd.f32 %v333_v27, %v323_v28 }
 0x115   : > { %v335_v30 = vmul.f32 0.5, %v334_v29 }
 0x117   : > { %471 = vtanh.f32 %v335_v30 }
 0x121   : > { %v472_v31 = vpop.eup %471 }
 0x122   : > { %v337_v32 = vmul.f32 0.5, %v472_v31 }
 0x124   : > { %v338_v33 = vadd.f32 0.5, %v337_v32 }
 0x126   : > { %339 = vst [vmem:[%s216_s19] sm:$0x1] %v338_v33 }
 0x127   : > { %486 = shalt.err (!%p483_p3)
}
 0x128   : > { %s487_s11 = scalar_lea.hbm %s641_s6, 16  ;;  %s491_s14 = scalar_lea.hbm %s688_s5, 32 }
 0x129   : > { %p488_p4 = scmp.ne.s32.totalorder %s641_s6, %s487_s11  ;;  %p492_p9 = scmp.lt.u32.totalorder %s641_s6, %s688_s5 }
 0x12a   : > { %p493_p10 = scmp.lt.u32.totalorder %s491_s14, %s487_s11  ;;  %p495_p12 = scmp.lt.u32.totalorder %s487_s11, %s641_s6 }
 0x12b   : > { %p489_p7 = pnand %p488_p4, %p612_p5 }
 0x12c   : > { %p494_p11 = por %p493_p10, %p492_p9 }
 0x12d   : > { %p490_p8 = pneg %p489_p7 }
 0x12e   : > { %p496_p13 = por %p495_p12, %p494_p11 }
 0x130   : > { %p497_p0 = pnand %p496_p13, %p490_p8 }
 0x132   : > { %500 = shalt.err (!%p497_p0)
}
 0x133   : > { %425 = dma.vmem_to_hbm [thread:$0]  (%p612_p5), %s643_s24, 16, %s641_s6, %s341_s7  }
 0x134 PF: > { %p431_p1 = scmp.ge.s32.totalorder %s535_s23, 2  ;;  %s365_s17 = sand.u32 1, %s523_s20  }
 0x135   : > { %s366_s18 = scalar_lea.sflag [#allocation4], %s365_s17 }
 0x136   : > { %p428_p2 = pnand %p431_p1, %p616_p6 }
 0x138   : > { %518 = dma.done.wait (!%p428_p2), %s366_s18, 16  }
 0x139   : > { %520 = vsyncadd (!%p428_p2), %s366_s18, 4294967280  ;;  %p17_p3 = scmp.ge.s32.totalorder %s599_s25, 4   ;;  %s691_s20 = smov %s527_s21 }
 0x13a   : > { %s692_s21 = smov %s531_s22  ;;  %s693_s22 = smov %s610_s28 }
 0x13b   : > { %s694_s23 = smov %s599_s25  ;;  %19 = sbr.rel (!%p17_p3) target bundleno = 6 (0x6), region = 75 }
 0x142   :  { %370 = vsyncpa [#allocation4], 1 }
 0x143   :  { %372 = vsyncpa [#allocation4 + $0x1], 1 }

</bundles_post_ra>
